<compile_context>
chip_gen: v7x
topology: tpu7x:2x2x1
jax: 0.10.0
libtpu: 0.0.40
codegen_flags: <defaults>
</compile_context>

<pallas_src>
import jax
import jax.numpy as jnp
from jax.experimental import pallas as pl
from jax.experimental.pallas import tpu as pltpu


def _round_up(x, m):
    return ((x + m - 1) // m) * m


_VMEM_BUDGET = 24 * 1024 * 1024  # per-step estimate target (2x headroom < 48 MiB)


def _vmem_estimate(tb, F, A, Hp):
    """Rough per-step VMEM bytes for tile sizing / vmem_limit_bytes."""
    io = 2 * tb * (F + A) * 4 + 2 * tb * 4                     # 2x-buffered x tiles + q tile
    wts = 2 * ((F + A) * Hp * 2 + Hp * Hp * 2 + 3 * Hp * 4)    # resident weights (2 bufs)
    tmp = tb * (F + A) * 2 + tb * Hp * 2 + 2 * tb * Hp * 4     # bf16 casts + f32 h1/h2
    return io + wts + tmp


def q_mlp_kernel(xf_ref, xa_ref, w1f_ref, w1a_ref, b1_ref, w2_ref, b2_ref,
                 w3_ref, b3_ref, q_ref):
    # Layer 1: fused "concat" as two MXU pushes (bf16 operands, f32 accumulate).
    # Casting to bf16 happens here, in VMEM, so HBM only ever carries f32 inputs.
    xf = xf_ref[...].astype(jnp.bfloat16)
    xa = xa_ref[...].astype(jnp.bfloat16)
    h1 = (jnp.dot(xf, w1f_ref[...], preferred_element_type=jnp.float32)
          + jnp.dot(xa, w1a_ref[...], preferred_element_type=jnp.float32)
          + b1_ref[...])
    h1 = jnp.maximum(h1, 0.0)                      # f32 ReLU on the VPU

    # Layer 2: bf16 MXU matmul, f32 accumulate + bias + ReLU (lane-dense Hp).
    h2 = jnp.dot(h1.astype(jnp.bfloat16), w2_ref[...],
                 preferred_element_type=jnp.float32) + b2_ref[...]
    h2 = jnp.maximum(h2, 0.0)

    # Output head (Hp <= ~128): VPU multiply + XLU cross-lane reduce against
    # the resident [1, Hp] weight row, plus the SMEM scalar bias.
    q = jnp.sum(h2 * w3_ref[...], axis=-1, keepdims=True) + b3_ref[0]
    q_ref[...] = q.astype(q_ref.dtype)


def multilayer_q(features, actions, params, *, block_b=8192):
    """features: [B, F] f32, actions: [B, A] f32 -> q: [B, 1] f32."""
    w1, b1, w2, b2, w3, b3 = params
    B, F = features.shape
    A = actions.shape[1]
    H = w1.shape[1]

    features = features.astype(jnp.float32)
    actions = actions.astype(jnp.float32)

    # Zero-pad the hidden dim to a lane-dense multiple of 128 (weights only).
    # Exact: padded h1/h2 columns are relu(0)=0 and padded w3 rows are 0.
    Hp = _round_up(H, 128)
    if Hp != H:
        w1 = jnp.pad(w1, ((0, 0), (0, Hp - H)))
        w2 = jnp.pad(w2, ((0, Hp - H), (0, Hp - H)))
        b1 = jnp.pad(b1, (0, Hp - H))
        b2 = jnp.pad(b2, (0, Hp - H))
        w3 = jnp.pad(w3, ((0, Hp - H), (0, 0)))

    # Split W1 to match the separate features/actions streams (concat order).
    w1f = w1[:F].astype(jnp.bfloat16)
    w1a = w1[F:F + A].astype(jnp.bfloat16)
    w2b = w2.astype(jnp.bfloat16)
    b1r = b1.reshape(1, Hp).astype(jnp.float32)
    b2r = b2.reshape(1, Hp).astype(jnp.float32)
    w3row = w3.reshape(1, Hp).astype(jnp.float32)
    b3s = b3.reshape(1).astype(jnp.float32)        # SMEM scalar

    # Batch tile: as large as the VMEM budget allows (amortizes per-step
    # pipeline overhead), multiple of 8 for f32 sublanes. Ragged tails are
    # handled by Pallas' partial last block, not wrapper padding.
    tb = max(8, _round_up(min(block_b, B), 8))
    while tb > 8 and _vmem_estimate(tb, F, A, Hp) > _VMEM_BUDGET:
        tb = max(8, _round_up(tb // 2, 8))
    grid = (pl.cdiv(B, tb),)

    vmem_limit = int(min(48 * 1024 * 1024,
                         max(32 * 1024 * 1024,
                             2 * _vmem_estimate(tb, F, A, Hp))))

    out = pl.pallas_call(
        q_mlp_kernel,
        out_shape=jax.ShapeDtypeStruct((B, 1), jnp.float32),
        grid=grid,
        in_specs=[
            pl.BlockSpec((tb, F), lambda i: (i, 0)),     # features tile (f32)
            pl.BlockSpec((tb, A), lambda i: (i, 0)),     # actions tile (f32)
            pl.BlockSpec((F, Hp), lambda i: (0, 0)),     # W1f: resident
            pl.BlockSpec((A, Hp), lambda i: (0, 0)),     # W1a: resident
            pl.BlockSpec((1, Hp), lambda i: (0, 0)),     # b1: resident
            pl.BlockSpec((Hp, Hp), lambda i: (0, 0)),    # W2: resident
            pl.BlockSpec((1, Hp), lambda i: (0, 0)),     # b2: resident
            pl.BlockSpec((1, Hp), lambda i: (0, 0)),     # w3 row: resident
            pl.BlockSpec(memory_space=pltpu.MemorySpace.SMEM),  # b3 scalar
        ],
        out_specs=pl.BlockSpec((tb, 1), lambda i: (i, 0)),
        compiler_params=pltpu.CompilerParams(
            dimension_semantics=("parallel",),           # batch tiles independent
            vmem_limit_bytes=vmem_limit,
        ),
    )(features, actions, w1f, w1a, b1r, w2b, b2r, w3row, b3s)
    return out


def init_params(key, feat_dim, act_dim, hidden):
    """Deterministic synthetic MLP parameters (Kaiming-ish scaling), f32."""
    k1, k2, k3 = jax.random.split(key, 3)
    in_dim = feat_dim + act_dim
    w1 = jax.random.normal(k1, (in_dim, hidden), jnp.float32) * (2.0 / in_dim) ** 0.5
    w2 = jax.random.normal(k2, (hidden, hidden), jnp.float32) * (2.0 / hidden) ** 0.5
    w3 = jax.random.normal(k3, (hidden, 1), jnp.float32) * (2.0 / hidden) ** 0.5
    b1 = jnp.zeros((hidden,), jnp.float32)
    b2 = jnp.zeros((hidden,), jnp.float32)
    b3 = jnp.zeros((1,), jnp.float32)
    return (w1, b1, w2, b2, w3, b3)


def reference(features, actions, params):
    """Pure-JAX reference mirroring the kernel's split-W1 / bf16-MXU casts."""
    w1, b1, w2, b2, w3, b3 = params
    F = features.shape[1]
    h1 = jax.nn.relu(
        jnp.dot(features.astype(jnp.bfloat16), w1[:F].astype(jnp.bfloat16),
                preferred_element_type=jnp.float32)
        + jnp.dot(actions.astype(jnp.bfloat16), w1[F:].astype(jnp.bfloat16),
                  preferred_element_type=jnp.float32)
        + b1)
    h2 = jax.nn.relu(
        jnp.dot(h1.astype(jnp.bfloat16), w2.astype(jnp.bfloat16),
                preferred_element_type=jnp.float32) + b2)
    return jnp.sum(h2 * w3.reshape(1, -1), axis=-1, keepdims=True) + b3


if __name__ == "__main__":
    # Small shapes; B is deliberately NOT a multiple of the tile and block_b is
    # forced small so the multi-step grid, the partial last block, and the
    # H->128 padding path are all exercised.
    B, F, A, H = 40, 16, 4, 32
    key = jax.random.PRNGKey(0)
    kf, ka, kp = jax.random.split(key, 3)
    features = jax.random.normal(kf, (B, F), jnp.float32)
    actions = jax.random.normal(ka, (B, A), jnp.float32)
    params = init_params(kp, F, A, H)

    q = multilayer_q(features, actions, params, block_b=16)
    q = jax.block_until_ready(q)

    q_ref = reference(features, actions, params)
    assert q.shape == (B, 1), q.shape
    assert jnp.allclose(q, q_ref, atol=1e-3, rtol=1e-3), (
        float(jnp.max(jnp.abs(q - q_ref))))
    print("KERNEL_OK")
</pallas_src>

<mosaic_0001>
module attributes {stable_mosaic.version = 11 : i64} {
  func.func @q_mlp_kernel(%arg0: i32, %arg1: memref<16x16xf32, #tpu.memory_space<vmem>>, %arg2: memref<16x4xf32, #tpu.memory_space<vmem>>, %arg3: memref<16x128xbf16, #tpu.memory_space<vmem>>, %arg4: memref<4x128xbf16, #tpu.memory_space<vmem>>, %arg5: memref<1x128xf32, #tpu.memory_space<vmem>>, %arg6: memref<128x128xbf16, #tpu.memory_space<vmem>>, %arg7: memref<1x128xf32, #tpu.memory_space<vmem>>, %arg8: memref<1x128xf32, #tpu.memory_space<vmem>>, %arg9: memref<1xf32, #tpu.memory_space<smem>>, %arg10: memref<16x1xf32, #tpu.memory_space<vmem>>) attributes {dimension_semantics = [#tpu.dimension_semantics<parallel>], iteration_bounds = array<i64: 3>, scalar_prefetch = 0 : i64, scratch_operands = 0 : i64, tpu.core_type = #tpu.core_type<tc>, window_params = [{transform_indices = @transform_0, window_bounds = array<i64: 16, 16>}, {transform_indices = @transform_1, window_bounds = array<i64: 16, 4>}, {pipeline_mode = #tpu.pipeline_mode<synchronous>, transform_indices = @transform_2, window_bounds = array<i64: 16, 128>}, {pipeline_mode = #tpu.pipeline_mode<synchronous>, transform_indices = @transform_3, window_bounds = array<i64: 4, 128>}, {pipeline_mode = #tpu.pipeline_mode<synchronous>, transform_indices = @transform_4, window_bounds = array<i64: 1, 128>}, {pipeline_mode = #tpu.pipeline_mode<synchronous>, transform_indices = @transform_5, window_bounds = array<i64: 128, 128>}, {pipeline_mode = #tpu.pipeline_mode<synchronous>, transform_indices = @transform_6, window_bounds = array<i64: 1, 128>}, {pipeline_mode = #tpu.pipeline_mode<synchronous>, transform_indices = @transform_7, window_bounds = array<i64: 1, 128>}, {transform_indices = @transform_8, window_bounds = array<i64: 1>}, {transform_indices = @transform_9, window_bounds = array<i64: 16, 1>}]} {
    %c0 = arith.constant 0 : index
    %c0_0 = arith.constant 0 : index
    %0 = vector.load %arg1[%c0, %c0_0] : memref<16x16xf32, #tpu.memory_space<vmem>>, vector<16x16xf32>
    %1 = arith.truncf %0 : vector<16x16xf32> to vector<16x16xbf16>
    %c0_1 = arith.constant 0 : index
    %c0_2 = arith.constant 0 : index
    %2 = vector.load %arg2[%c0_1, %c0_2] : memref<16x4xf32, #tpu.memory_space<vmem>>, vector<16x4xf32>
    %3 = arith.truncf %2 : vector<16x4xf32> to vector<16x4xbf16>
    %c0_3 = arith.constant 0 : index
    %c0_4 = arith.constant 0 : index
    %4 = vector.load %arg3[%c0_3, %c0_4] : memref<16x128xbf16, #tpu.memory_space<vmem>>, vector<16x128xbf16>
    %cst = arith.constant dense<0.000000e+00> : vector<16x128xf32>
    %5 = tpu.matmul %1, %4, %cst {dimension_numbers = #tpu.dot_dimension_numbers<[1], [0], [0], [1], [0, 0, 1, 1], [], []>} : vector<16x16xbf16>, vector<16x128xbf16>, vector<16x128xf32> -> vector<16x128xf32>
    %c0_5 = arith.constant 0 : index
    %c0_6 = arith.constant 0 : index
    %6 = vector.load %arg4[%c0_5, %c0_6] : memref<4x128xbf16, #tpu.memory_space<vmem>>, vector<4x128xbf16>
    %cst_7 = arith.constant dense<0.000000e+00> : vector<16x128xf32>
    %7 = tpu.matmul %3, %6, %cst_7 {dimension_numbers = #tpu.dot_dimension_numbers<[1], [0], [0], [1], [0, 0, 1, 1], [], []>} : vector<16x4xbf16>, vector<4x128xbf16>, vector<16x128xf32> -> vector<16x128xf32>
    %8 = arith.addf %5, %7 : vector<16x128xf32>
    %c0_8 = arith.constant 0 : index
    %c0_9 = arith.constant 0 : index
    %9 = vector.load %arg5[%c0_8, %c0_9] : memref<1x128xf32, #tpu.memory_space<vmem>>, vector<1x128xf32>
    %10 = vector.broadcast %9 : vector<1x128xf32> to vector<16x128xf32>
    %11 = arith.addf %8, %10 : vector<16x128xf32>
    %cst_10 = arith.constant 0.000000e+00 : f32
    %12 = vector.broadcast %cst_10 : f32 to vector<16x128xf32>
    %13 = arith.maximumf %11, %12 : vector<16x128xf32>
    %14 = arith.truncf %13 : vector<16x128xf32> to vector<16x128xbf16>
    %c0_11 = arith.constant 0 : index
    %c0_12 = arith.constant 0 : index
    %15 = vector.load %arg6[%c0_11, %c0_12] : memref<128x128xbf16, #tpu.memory_space<vmem>>, vector<128x128xbf16>
    %cst_13 = arith.constant dense<0.000000e+00> : vector<16x128xf32>
    %16 = tpu.matmul %14, %15, %cst_13 {dimension_numbers = #tpu.dot_dimension_numbers<[1], [0], [0], [1], [0, 0, 1, 1], [], []>} : vector<16x128xbf16>, vector<128x128xbf16>, vector<16x128xf32> -> vector<16x128xf32>
    %c0_14 = arith.constant 0 : index
    %c0_15 = arith.constant 0 : index
    %17 = vector.load %arg7[%c0_14, %c0_15] : memref<1x128xf32, #tpu.memory_space<vmem>>, vector<1x128xf32>
    %18 = vector.broadcast %17 : vector<1x128xf32> to vector<16x128xf32>
    %19 = arith.addf %16, %18 : vector<16x128xf32>
    %cst_16 = arith.constant 0.000000e+00 : f32
    %20 = vector.broadcast %cst_16 : f32 to vector<16x128xf32>
    %21 = arith.maximumf %19, %20 : vector<16x128xf32>
    %c0_17 = arith.constant 0 : index
    %c0_18 = arith.constant 0 : index
    %22 = vector.load %arg8[%c0_17, %c0_18] : memref<1x128xf32, #tpu.memory_space<vmem>>, vector<1x128xf32>
    %23 = vector.broadcast %22 : vector<1x128xf32> to vector<16x128xf32>
    %24 = arith.mulf %21, %23 : vector<16x128xf32>
    %cst_19 = arith.constant dense<0.000000e+00> : vector<16xf32>
    %25 = vector.multi_reduction <add>, %24, %cst_19 [1] : vector<16x128xf32> to vector<16xf32>
    %26 = vector.shape_cast %25 : vector<16xf32> to vector<16x1xf32>
    %c0_20 = arith.constant 0 : index
    %27 = memref.load %arg9[%c0_20] : memref<1xf32, #tpu.memory_space<smem>>
    %28 = vector.broadcast %27 : f32 to vector<16x1xf32>
    %29 = arith.addf %26, %28 : vector<16x1xf32>
    %c0_21 = arith.constant 0 : index
    %c0_22 = arith.constant 0 : index
    %30 = vector.load %arg10[%c0_21, %c0_22] : memref<16x1xf32, #tpu.memory_space<vmem>>, vector<16x1xf32>
    tpu.vector_store %arg10[%c0_21, %c0_22], %29 {strides = array<i32>} : memref<16x1xf32, #tpu.memory_space<vmem>>, vector<16x1xf32>,
    return
  }
  func.func @transform_0(%arg0: i32) -> (i32, i32) {
    %c0_i32 = arith.constant 0 : i32
    %c0_i32_0 = arith.constant 0 : i32
    return %arg0, %c0_i32 : i32, i32
  }
  func.func @transform_1(%arg0: i32) -> (i32, i32) {
    %c0_i32 = arith.constant 0 : i32
    %c0_i32_0 = arith.constant 0 : i32
    return %arg0, %c0_i32 : i32, i32
  }
  func.func @transform_2(%arg0: i32) -> (i32, i32) {
    %c0_i32 = arith.constant 0 : i32
    %c0_i32_0 = arith.constant 0 : i32
    %c0_i32_1 = arith.constant 0 : i32
    return %c0_i32, %c0_i32_0 : i32, i32
  }
  func.func @transform_3(%arg0: i32) -> (i32, i32) {
    %c0_i32 = arith.constant 0 : i32
    %c0_i32_0 = arith.constant 0 : i32
    %c0_i32_1 = arith.constant 0 : i32
    return %c0_i32, %c0_i32_0 : i32, i32
  }
  func.func @transform_4(%arg0: i32) -> (i32, i32) {
    %c0_i32 = arith.constant 0 : i32
    %c0_i32_0 = arith.constant 0 : i32
    %c0_i32_1 = arith.constant 0 : i32
    return %c0_i32, %c0_i32_0 : i32, i32
  }
  func.func @transform_5(%arg0: i32) -> (i32, i32) {
    %c0_i32 = arith.constant 0 : i32
    %c0_i32_0 = arith.constant 0 : i32
    %c0_i32_1 = arith.constant 0 : i32
    return %c0_i32, %c0_i32_0 : i32, i32
  }
  func.func @transform_6(%arg0: i32) -> (i32, i32) {
    %c0_i32 = arith.constant 0 : i32
    %c0_i32_0 = arith.constant 0 : i32
    %c0_i32_1 = arith.constant 0 : i32
    return %c0_i32, %c0_i32_0 : i32, i32
  }
  func.func @transform_7(%arg0: i32) -> (i32, i32) {
    %c0_i32 = arith.constant 0 : i32
    %c0_i32_0 = arith.constant 0 : i32
    %c0_i32_1 = arith.constant 0 : i32
    return %c0_i32, %c0_i32_0 : i32, i32
  }
  func.func @transform_8(%arg0: i32) -> i32 {
    %c0_i32 = arith.constant 0 : i32
    %c0_i32_0 = arith.constant 0 : i32
    return %c0_i32 : i32
  }
  func.func @transform_9(%arg0: i32) -> (i32, i32) {
    %c0_i32 = arith.constant 0 : i32
    %c0_i32_0 = arith.constant 0 : i32
    return %arg0, %c0_i32 : i32, i32
  }
}

</mosaic_0001>

<bundles_post_ra>
// kernel: tpu_custom_call.1
= control target key start
LH: loop header
LB: loop body
LE: loop exit
PB: predicated region body
PF: predicated region fallthrough
CT: control target
= control target key end

     0   :  { %s1342_s0 = inlined_call_operand.vmem [shape: f32[40,16], index: 0, kind: input, shape index: {}]   ;;  %s1343_s1 = inlined_call_operand.vmem [shape: f32[40,4], index: 1, kind: input, shape index: {}]   ;;  %s1344_s2 = inlined_call_operand.vmem [shape: bf16[16,128], index: 2, kind: input, shape index: {}]   ;;  %s1345_s3 = inlined_call_operand.vmem [shape: bf16[4,128], index: 3, kind: input, shape index: {}]   ;;  %s1346_s4 = inlined_call_operand.vmem [shape: f32[1,128], index: 4, kind: input, shape index: {}]   ;;  %s1347_s5 = inlined_call_operand.vmem [shape: bf16[128,128], index: 5, kind: input, shape index: {}]   ;;  %s1348_s6 = inlined_call_operand.vmem [shape: f32[1,128], index: 6, kind: input, shape index: {}]   ;;  %s1349_s7 = inlined_call_operand.vmem [shape: f32[1,128], index: 7, kind: input, shape index: {}]   ;;  %s1350_s8 = inlined_call_operand.<no memory space> [shape: f32[1], index: 8, kind: input, shape index: {}]   ;;  %s1351_s9 = inlined_call_operand.vmem [shape: f32[40,1], index: 9, kind: output, shape index: {}]  }
   0x1   :  { %14 = sst [smem:[#allocation2]] %s1350_s8 }
   0x2   :  { %s1214_s11 = smov 0   ;;  %s1216_s12 = smov 0  }
   0x3   :  { %s1218_s13 = smov 0  }
   0x4 LB: > { %s1227_s8 = sadd.s32 4294967295, %s1125_s13   ;;  %s1229_s14 = sadd.s32 1, %s1125_s13   ;;  %s1125_s13 = sphi %s1218_s13, %s1355_s13   ;;  %s1121_s12 = sphi %s1216_s12, %s1354_s12   ;;  %s1117_s11 = sphi %s1214_s11, %s1353_s11  }
   0x5   : > { %s223_s15 = ssub.s32 %s1125_s13, %s1229_s14  ;;  %s226_s16 = sadd.s32 1, %s1121_s12 }
   0x6   : > { %p224_p0 = scmp.eq.s32.totalorder %s223_s15, 0  ;;  %p236_p1 = scmp.ne.s32.totalorder %s1121_s12, %s1117_s11 }
   0x7   : > { %p237_p2 = scmp.eq.s32.totalorder %s1227_s8, 2  ;;  %p887_p3 = scmp.ge.s32.totalorder %s1125_s13, 1 }
   0x8   : > { %s1237_s17 = scalar_select %p224_p0, %s1121_s12, %s226_s16  }
   0x9   : > { %p1239_p4 = por %p237_p2, %p236_p1  ;;  %p316_p5 = scmp.lt.s32.totalorder %s1125_s13, 4 }
   0xb   : > { %p317_p6 = pnand %p887_p3, %p316_p5 }
   0xc   : > { %v406_v0 = vld [vmem:[%s1345_s3] sm:$0x3] (!%p317_p6)  ;;  %vm411_vm0 = vcmask (!%p317_p6), 1041408   ;;  %s1247_s21 = sshll.u32 (!%p317_p6), %s1227_s8, 1  ;;  %v1159_v1 = vmov (!%p317_p6), 0.0   ;;  %vm1160_vm1 = vmmov (!%p317_p6), 0  }
   0xd   : > { %320 = sbr.rel (%p317_p6) target bundleno = 673 (0x2a1), region = 56  ;;  %940 = vmatprep.subr.bf16.mxu1 (!%p317_p6), %v1159_v1  ;;  %v413_v2 = vsel (!%p317_p6), %vm411_vm0, %v406_v0, 0  ;;  %942 = vmatprep.mubr.msk.bf16.mxu1 (!%p317_p6), %vm1160_vm1, %v1159_v1  ;;  %p369_p7 = scmp.lt.s32.totalorder (!%p317_p6), %s1247_s21, 4  ;;  %v1063_v3 = vld [vmem:[%s1347_s5] sm:$0xff] (!%p317_p6)   ;;  %v1064_v4 = vld [vmem:[%s1347_s5 + $0x8] sm:$0xff] (!%p317_p6)   ;;  %v1065_v7 = vld [vmem:[%s1347_s5 + $0x10] sm:$0xff] (!%p317_p6)  }
   0xe   : > { %941 = vmatpush3.bf16.msra.mxu1 (!%p317_p6), %v413_v2  ;;  %952 = vmatprep.subr.bf16.mxu0 (!%p317_p6), %v1159_v1  ;;  %v1062_v6 = vld [vmem:[%s1344_s2] sm:$0xff] (!%p317_p6)   ;;  %vm407_vm2 = vcmask (!%p317_p6), 31744   ;;  %vm462_vm3 = vcmask (!%p317_p6), 130048   ;;  %v1066_v13 = vld [vmem:[%s1347_s5 + $0x18] sm:$0xff] (!%p317_p6)   ;;  %v1068_v15 = vld [vmem:[%s1347_s5 + $0x28] sm:$0xff] (!%p317_p6)   ;;  %s361_s25 = sand.u32 (!%p317_p6), 1, %s1117_s11  }
   0xf   : > { %946 = vmatprep.subr.bf16.mxu1 (!%p317_p6), %v1159_v1  ;;  %968 = vmatprep.mubr.msk.bf16.mxu0 (!%p317_p6), %vm1160_vm1, %v1159_v1  ;;  %v1067_v14 = vld [vmem:[%s1347_s5 + $0x20] sm:$0xff] (!%p317_p6)   ;;  %v1069_v16 = vld [vmem:[%s1347_s5 + $0x30] sm:$0xff] (!%p317_p6)   ;;  %v1070_v17 = vld [vmem:[%s1347_s5 + $0x38] sm:$0xff] (!%p317_p6)   ;;  %s888_s26 = sshll.u32 (!%p317_p6), %s361_s25, 4  ;;  %vm650_vm4 = vcmask (!%p317_p6), 7168  }
  0x10   : > { %953 = vmatpush3.bf16.msra.mxu0 (!%p317_p6), %v1063_v3  ;;  %v896_v23 = vld [vmem:[%s1346_s4] ss:$0 sm:$0xff] (!%p317_p6) }
  0x11   : > { %954 = vmatprep.subr.bf16.mxu0 (!%p317_p6), %v1159_v1  ;;  %v897_v34 = vld [vmem:[%s1348_s6] ss:$0 sm:$0xff] (!%p317_p6) }
  0x12   : > { %v906_v39 = vld [vmem:[%s1349_s7] ss:$0 sm:$0xff] (!%p317_p6) }
  0x14   : > { %s370_s24 = scalar_select %p369_p7, %s1247_s21, 4  ;;  %955 = vmatpush3.bf16.msra.mxu0 %v1064_v4 }
  0x15   : > { %956 = vmatprep.subr.bf16.mxu0 %v1159_v1  ;;  %s661_s28 = ssub.s32 (%p1239_p4), 5, %s1247_s21  ;;  %s924_s11 = sshll.u32 (%p1239_p4), %s1227_s8, 4 }
  0x16   : > { %s890_s27 = sshll.u32 %s370_s24, 3  ;;  %s646_s24 = sld [smem:[#allocation2]] }
  0x17   : > { %s386_s30 = scalar_lea.vmem %s1343_s1, %s890_s27  ;;  %s372_s22 = scalar_lea.vmem %s1342_s0, %s890_s27 }
  0x18   : > { %v401_v5 = vld [vmem:[%s386_s30] sm:$0xff]  ;;  %v402_v8 = vld [vmem:[%s386_s30 + $0x8] sm:$0xff]  ;;  %957 = vmatpush3.bf16.msra.mxu0 %v1065_v7  ;;  %s1297_s27 = scalar_lea.vmem [#allocation3], %s888_s26   ;;  %p662_p8 = scmp.lt.s32.totalorder (%p1239_p4), %s661_s28, 2 }
  0x19   : > { %v403_v9 = vpack.c.bf16 %v402_v8, %v401_v5  ;;  %v398_v10 = vld [vmem:[%s372_s22] sm:$0xff]  ;;  %v399_v11 = vld [vmem:[%s372_s22 + $0x8] sm:$0xff]  ;;  %958 = vmatprep.subr.bf16.mxu0 %v1159_v1  ;;  %s1308_s10 = scalar_lea.vmem (%p1239_p4), %s1351_s9, %s924_s11  }
  0x1a   : > { %v400_v12 = vpack.c.bf16 %v399_v11, %v398_v10 }
  0x1b   : > { %943 = vmatmul.mubr.msk.bf16.vlgmr.msra.gmra.mrb[0].mxu1 %vm407_vm2, %v403_v9 }
  0x1c   : > { %947 = vmatpush3.bf16.msra.mxu1 %v1062_v6  ;;  %948 = vmatprep.mubr.msk.bf16.mxu1 %vm1160_vm1, %v1159_v1  ;;  %v647_v46 = vstv %s646_s24 }
  0x1d   : > { %959 = vmatpush3.bf16.msra.mxu0 %v1066_v13 }
  0x1e   : > { %960 = vmatprep.subr.bf16.mxu0 %v1159_v1 }
  0x21   : > { %961 = vmatpush3.bf16.msra.mxu0 %v1067_v14 }
  0x22   : > { %962 = vmatprep.subr.bf16.mxu0 %v1159_v1 }
  0x23   : > { %949 = vmatmul.mubr.msk.bf16.vlgmr.msra.gmra.mrb[4].mxu1 %vm462_vm3, %v400_v12 }
  0x25   : > { %963 = vmatpush3.bf16.msra.mxu0 %v1068_v15 }
  0x26   : > { %964 = vmatprep.subr.bf16.mxu0 %v1159_v1 }
  0x29   : > { %965 = vmatpush3.bf16.msra.mxu0 %v1069_v16 }
  0x2a   : > { %966 = vmatprep.subr.bf16.mxu0 %v1159_v1 }
  0x2d   : > { %967 = vmatpush3.bf16.msra.mxu0 %v1070_v17 }
  0xee   : > { %v449_v18 = vpop.f32.mrb[0].mxu1 }
  0xef   : > { %v944_v19 = vpop.f32.mrb[1].mxu1 }
  0xf0   : > { %v452_v20 = vpop.f32.mrb[2].mxu1 }
  0xf1   : > { %v945_v21 = vpop.f32.mrb[3].mxu1 }
  0xf6   : > { %v500_v22 = vpop.f32.mrb[4].mxu1 }
  0xf7   : > { %v501_v24 = vadd.f32 %v500_v22, %v449_v18  ;;  %v950_v25 = vpop.f32.mrb[5].mxu1 }
  0xf8   : > { %v503_v26 = vpop.f32.mrb[6].mxu1 }
  0xf9   : > { %v514_v27 = vadd.f32 %v896_v23, %v501_v24  ;;  %v504_v28 = vadd.f32 %v503_v26, %v452_v20  ;;  %v951_v29 = vpop.f32.mrb[7].mxu1 }
  0xfb   : > { %v515_v30 = vadd.f32 %v896_v23, %v504_v28  ;;  %v516_v31 = vmax.f32 %v514_v27, 0.0 }
  0xfd   : > { %v517_v32 = vmax.f32 %v515_v30, 0.0 }
  0xff   : > { %v518_v33 = vpack.c.bf16 %v517_v32, %v516_v31 }
 0x101   : > { %969 = vmatmul.mubr.bf16.vlgmr.msra.gmra.mrb[0].mxu0 %v518_v33 }
 0x1d4   : > { %v624_v35 = vpop.f32.mrb[0].mxu0 }
 0x1d5   : > { %v625_v36 = vadd.f32 %v897_v34, %v624_v35  ;;  %v970_v37 = vpop.f32.mrb[1].mxu0 }
 0x1d6   : > { %v627_v38 = vpop.f32.mrb[2].mxu0 }
 0x1d7   : > { %v631_v40 = vmax.f32 %v625_v36, 0.0  ;;  %v628_v41 = vadd.f32 %v897_v34, %v627_v38  ;;  %v971_v42 = vpop.f32.mrb[3].mxu0 }
 0x1d9   : > { %v632_v43 = vmax.f32 %v628_v41, 0.0  ;;  %v640_v44 = vmul.f32 %v906_v39, %v631_v40 }
 0x1db   : > { %642 = vadd.xlane.f32.xlu0 %v640_v44  ;;  %v641_v45 = vmul.f32 %v906_v39, %v632_v43 }
 0x1df   : > { %644 = vadd.xlane.f32.xlu0 %v641_v45 }
 0x268   : > { %v643_v47 = vpop.xlane.xlu0 %642 }
 0x269   : > { %v648_v48 = vadd.f32 %v647_v46, %v643_v47  ;;  %659 = sbr.rel (!%p1239_p4) target bundleno = 673 (0x2a1), region = 60 }
 0x26b   : > { %651 = vst.msk [vmem:[%s1297_s27] sm:$0xff] %vm650_vm4, %v648_v48 }
 0x26c   : > { %v645_v49 = vpop.xlane.xlu0 %644 }
 0x26d   : > { %v649_v50 = vadd.f32 %v647_v46, %v645_v49 }
 0x26f   : > { %652 = vst.msk [vmem:[%s1297_s27 + $0x8] sm:$0xff] %vm650_vm4, %v649_v50 }
 0x270   : > { %s1357_s28 = smov (!%p662_p8, %s661_s28), 2 }
 0x271   : > { %s909_s13 = sshll.u32 %s1357_s28, 7 }
 0x272   : > { %p912_p9 = scmp.eq.s32.totalorder %s909_s13, 0 }
 0x273   : > { %s1314_s15 = sshrl.u32 (!%p912_p9), %s1357_s28, 1 }
 0x274   : > { %670 = sbr.rel (%p912_p9) target bundleno = 673 (0x2a1), region = 64  ;;  %p913_p10 = scmp.le.s32.totalorder (!%p912_p9), %s1314_s15, 0 }
 0x27b   : > { %834 = sbr.rel (%p913_p10) target bundleno = 652 (0x28c), region = 143  ;;  %s1127_s8 = smov (!%p913_p10), %s1308_s10  }
 0x27c   : > { %s1131_s18 = smov (!%p913_p10), %s1297_s27   ;;  %s1135_s21 = smov (!%p913_p10), 0  }
 0x27d   : > { %s1139_s16 = smov (!%p913_p10), 0  }
 0x282 LB: >> { %v734_v51 = vld [vmem:[%s1133_s18] sm:$0xff]  ;;  %v736_v52 = vld [vmem:[%s1133_s18 + $0x8] sm:$0xff]  ;;  %s738_s19 = sadd.s32 1, %s1137_s21  ;;  %s728_s16 = sadd.s32 1, %s1141_s16   ;;  %s1141_s16 = sphi %s1139_s16, %s728_s16   ;;  %s1137_s21 = sphi %s1135_s21, %s1136_s21   ;;  %s1133_s18 = sphi %s1131_s18, %s743_s18   ;;  %s1129_s8 = sphi %s1127_s8, %s744_s8  }
 0x283   : >> { %735 = vst [vmem:[%s1129_s8] sm:$0xff] %v734_v51  ;;  %737 = vst [vmem:[%s1129_s8 + $0x8] sm:$0xff] %v736_v52  ;;  %p739_p11 = scmp.ge.s32.totalorder %s738_s19, %s1314_s15  ;;  %p727_p12 = scmp.ge.s32.totalorder %s728_s16, %s1314_s15 }
 0x285   : >> { %s1359_s19 = smov (%p739_p11, %s738_s19), 0  ;;  %730 = sbr.rel (!%p727_p12) target bundleno = 642 (0x282), region = 149 }
 0x286   : >> { %s914_s20 = sshll.u32 %s1359_s19, 4  ;;  %s1136_s21 = smov %s1359_s19  }
 0x287   : >> { %s743_s18 = scalar_lea.vmem %s1297_s27, %s914_s20 [#allocation3]   ;;  %s744_s8 = scalar_lea.vmem %s1308_s10, %s914_s20  }
 0x28c PF: > { %s1324_s22 = sand.u32 1, %s1357_s28   ;;  %s925_s23 = sshll.u32 %s1314_s15, 4 }
 0x28d   : > { %s749_s24 = scalar_lea.vmem %s1297_s27, %s925_s23 [#allocation3]   ;;  %s751_s25 = scalar_lea.vmem %s1308_s10, %s925_s23  }
 0x28e   : > { %p919_p13 = scmp.le.s32.totalorder %s1324_s22, 0 }
 0x28f   : > { %s1143_s26 = smov (!%p919_p13), %s751_s25   ;;  %s1147_s11 = smov (!%p919_p13), %s749_s24  }
 0x290   : > { %848 = sbr.rel (%p919_p13) target bundleno = 673 (0x2a1), region = 154  ;;  %s1151_s29 = smov (!%p919_p13), 0  }
 0x291   : > { %s1155_s30 = smov (!%p919_p13), 0  }
 0x297 LB: >> { %v761_v53 = vld [vmem:[%s1149_s11] sm:$0xff]  ;;  %s763_s28 = sadd.s32 1, %s1153_s29  ;;  %s755_s30 = sadd.s32 1, %s1157_s30   ;;  %s1157_s30 = sphi %s1155_s30, %s755_s30   ;;  %s1153_s29 = sphi %s1151_s29, %s1152_s29   ;;  %s1149_s11 = sphi %s1147_s11, %s768_s11   ;;  %s1145_s26 = sphi %s1143_s26, %s769_s26  }
 0x298   : >> { %762 = vst [vmem:[%s1145_s26] sm:$0xff] %v761_v53  ;;  %p764_p0 = scmp.ge.s32.totalorder %s763_s28, %s1324_s22  ;;  %p754_p1 = scmp.ge.s32.totalorder %s755_s30, %s1324_s22 }
 0x29a   : >> { %s1361_s28 = smov (%p764_p0, %s763_s28), 0  ;;  %757 = sbr.rel (!%p754_p1) target bundleno = 663 (0x297), region = 160 }
 0x29b   : >> { %s920_s27 = sshll.u32 %s1361_s28, 3  ;;  %s1152_s29 = smov %s1361_s28  }
 0x29c   : >> { %s768_s11 = scalar_lea.vmem %s749_s24, %s920_s27 [#allocation3]   ;;  %s769_s26 = scalar_lea.vmem %s751_s25, %s920_s27  }
 0x2a1 PF: > { %p17_p2 = scmp.ge.s32.totalorder %s1229_s14, 5   ;;  %s1353_s11 = smov %s1121_s12 }
 0x2a2   : > { %s1354_s12 = smov %s1237_s17  ;;  %s1355_s13 = smov %s1229_s14 }
 0x2a3   :  { %19 = sbr.rel (!%p17_p2) target bundleno = 4 (0x4), region = 171 }

</bundles_post_ra>
